<compile_context>
chip_gen: v7x
topology: tpu7x:2x2x1
jax: 0.10.0
libtpu: 0.0.40
codegen_flags: <defaults>
</compile_context>

<pallas_src>
import jax
import jax.numpy as jnp
import numpy as np
from jax.experimental import pallas as pl
from jax.experimental.pallas import tpu as pltpu

LANE = 128


def _im2col_s2_7x7(x_nhwc):
    """Stride-2 7x7 patches (pad 3) -> (N*Ho*Wo, Cin*49); flatten order (ci, kh, kw)."""
    N, H, W, C = x_nhwc.shape
    xp = jnp.pad(x_nhwc, ((0, 0), (3, 3), (3, 3), (0, 0)))
    Ho, Wo = H // 2, W // 2
    cols = []
    for kh in range(7):
        for kw in range(7):
            cols.append(xp[:, kh:kh + 2 * Ho:2, kw:kw + 2 * Wo:2, :])  # (N,Ho,Wo,C)
    pat = jnp.stack(cols, axis=-1)                                     # (N,Ho,Wo,C,49)
    return pat.reshape(N * Ho * Wo, C * 49), Ho, Wo


def _fused_kernel(p_ref, w_ref, b_ref, o_ref):
    # Single wide MXU matmul: 7x7 / 3x3 / 5x5 / depthwise+pointwise / FactorizedReduce
    # branches all folded into (K, CP) weight columns; alphas, BN scale and all biases
    # were folded in the glue.  f32 accumulation, bias add, cast to output dtype.
    acc = jnp.dot(p_ref[...], w_ref[...], preferred_element_type=jnp.float32)
    o_ref[...] = (acc + b_ref[...]).astype(o_ref.dtype)


def conv_pool_block_forward(x_nchw, alpha, params,
                            matmul_dtype=jnp.bfloat16,
                            out_dtype=jnp.bfloat16,
                            row_tile=2048):
    """ConvPoolBlock.forward(input, alpha) for in_channels != out_channels (5 branches).

    Returns NHWC (N, H//2, W//2, Cout) in out_dtype.
    """
    f32 = jnp.float32
    x = jnp.transpose(x_nchw, (0, 2, 3, 1)).astype(f32)          # NCHW -> NHWC, f32
    N, H, W, Cin = x.shape
    Cout = params["w7"].shape[0]
    assert H % 2 == 0 and W % 2 == 0, "FactorizedReduce concat requires even H, W"
    assert Cin != Cout, "this instantiation covers the 5-branch (cin != cout) case"

    def _embed7(w):
        # torch (Cout, Cin, k, k) zero-embedded into the shared centered stride-2 7x7
        # footprint -> (Cin*49, Cout); row order (ci, kh, kw) matches the im2col flatten.
        co, ci, k, _ = w.shape
        off = (7 - k) // 2
        w7 = jnp.zeros((co, ci, 7, 7), f32)
        w7 = w7.at[:, :, off:off + k, off:off + k].set(w.astype(f32))
        return w7.reshape(co, -1).T

    def _mat1x1(w):   # (Cout', Cin, 1, 1) -> (Cin, Cout')
        return w.reshape(w.shape[0], -1).T.astype(f32)

    # ---- patch matrix (layout only; all MACs happen inside the kernel) ---------------
    x_mm = x.astype(matmul_dtype)
    p7, Ho, Wo = _im2col_s2_7x7(x_mm)              # (P, Cin*49) already in matmul_dtype
    P = N * Ho * Wo
    ps1 = x[:, 0::2, 0::2, :].reshape(P, Cin)      # FactorizedReduce conv_1 taps (f32)
    ps2 = x[:, 1::2, 1::2, :].reshape(P, Cin)      # conv_2 taps (== x[:,:,1:,1:] stride 2)
    rp = jnp.maximum(jnp.concatenate([ps1, ps2], axis=1), 0.0)     # ReLU in the glue

    # ---- fold the 4 linear conv branches (+ alphas, + depthwise∘pointwise) -----------
    a = alpha.astype(f32)
    wpt2d = params["wpt"][:, :, 0, 0].astype(f32)                          # (Cout, Cin)
    w_dp_eff = wpt2d[:, :, None, None] * params["wdep"].astype(f32)[:, 0][None]  # (Cout,Cin,3,3)
    Wconv = (a[0] * _embed7(params["w7"]) + a[1] * _embed7(params["w3"])
             + a[2] * _embed7(params["w5"]) + a[3] * _embed7(w_dp_eff))    # (Cin*49, Cout)
    bias = (a[0] * params["b7"] + a[1] * params["b3"] + a[2] * params["b5"]
            + a[3] * (wpt2d @ params["bdep"].astype(f32) + params["bpt"]))

    # ---- FactorizedReduce: block-diag 1x1 weights, train-mode BN folded to scale/shift
    half = Cout // 2
    Wsk = jnp.block([[_mat1x1(params["ws1"]), jnp.zeros((Cin, Cout - half), f32)],
                     [jnp.zeros((Cin, half), f32), _mat1x1(params["ws2"])]])  # (2Cin, Cout)
    # Tiny f32 XLA pre-pass for the batch statistics (training-mode BatchNorm2d), so the
    # kernel's row tiles stay independent and the row grid axis is legitimately parallel.
    h = jnp.dot(rp, Wsk, precision=jax.lax.Precision.HIGHEST)              # (P, Cout)
    mu = jnp.mean(h, axis=0)
    var = jnp.mean(jnp.square(h - mu), axis=0)                             # biased, as torch
    bn_scale = params["bn_gamma"].astype(f32) * jax.lax.rsqrt(var + 1e-5)
    bn_shift = params["bn_beta"].astype(f32) - mu * bn_scale
    bias = bias + a[4] * bn_shift

    # ---- single fused operand set: [7x7 footprint taps | ReLU'd skip taps] -----------
    Wall = jnp.concatenate([Wconv, Wsk * (a[4] * bn_scale)[None, :]], axis=0)  # (K, Cout)
    pall = jnp.concatenate([p7, rp.astype(matmul_dtype)], axis=1)              # (P, K)
    K = Cin * 49 + 2 * Cin

    # ---- lane-dense padding: K -> multiple of 128, Cout -> 128 lanes ------------------
    CP = pl.cdiv(Cout, LANE) * LANE
    Kpad = pl.cdiv(K, LANE) * LANE
    Wall_p = jnp.pad(Wall, ((0, Kpad - K), (0, CP - Cout))).astype(matmul_dtype)
    bias_p = jnp.pad(bias.reshape(1, Cout), ((0, 0), (0, CP - Cout))).astype(f32)

    # ---- row tiling: multiple of 16 (bf16 sublanes), >=2 grid steps (v7x megacore), ---
    # ---- working set capped well inside v7x's 64 MiB VMEM -----------------------------
    in_b = jnp.dtype(matmul_dtype).itemsize
    out_b = jnp.dtype(out_dtype).itemsize
    TP = min(int(row_tile), max(16, pl.cdiv(P, 2)))
    TP = ((TP + 15) // 16) * 16
    vmem_budget = 24 * 1024 * 1024          # double-buffered tiles, headroom under 40 MiB
    while TP > 16 and 2 * TP * (Kpad * in_b + CP * out_b) > vmem_budget:
        TP = max(16, ((TP // 2) // 16) * 16)
    ntiles = pl.cdiv(P, TP)
    Ppad = ntiles * TP
    pall_p = jnp.pad(pall, ((0, Ppad - P), (0, Kpad - K)))

    flops = 2 * Ppad * CP * Kpad
    bytes_accessed = int(pall_p.size * in_b + Wall_p.size * in_b
                         + bias_p.size * 4 + Ppad * CP * out_b)

    out = pl.pallas_call(
        _fused_kernel,
        out_shape=jax.ShapeDtypeStruct((Ppad, CP), out_dtype),
        grid=(ntiles,),
        in_specs=[
            pl.BlockSpec((TP, Kpad), lambda i: (i, 0)),        # fused patch matrix
            pl.BlockSpec((Kpad, CP), lambda i: (0, 0)),        # fused weights (resident)
            pl.BlockSpec((1, CP), lambda i: (0, 0)),           # fused bias / BN shift
        ],
        out_specs=pl.BlockSpec((TP, CP), lambda i: (i, 0)),
        compiler_params=pltpu.CompilerParams(
            dimension_semantics=("parallel",),                 # rows independent (BN hoisted)
            vmem_limit_bytes=40 * 1024 * 1024),                # fits v7x's 64 MiB VMEM
        cost_estimate=pl.CostEstimate(
            flops=flops, transcendentals=0, bytes_accessed=bytes_accessed),
    )(pall_p, Wall_p, bias_p)

    return out[:P, :Cout].reshape(N, Ho, Wo, Cout)              # NHWC


# ----------------------------- pure-JAX reference -------------------------------------
def _ref_forward(x_nchw, alpha, p):
    """ConvPoolBlock.forward via lax.conv (NCHW, f32, highest precision)."""
    dn = ("NCHW", "OIHW", "NCHW")
    hi = jax.lax.Precision.HIGHEST

    def conv(x, w, b, stride, pad, groups=1):
        y = jax.lax.conv_general_dilated(
            x, w, (stride, stride), [(pad, pad), (pad, pad)],
            dimension_numbers=dn, feature_group_count=groups, precision=hi)
        return y if b is None else y + b[None, :, None, None]

    y0 = conv(x_nchw, p["w7"], p["b7"], 2, 3)
    y1 = conv(x_nchw, p["w3"], p["b3"], 2, 1)      # module attribute named "conv5x5"
    y2 = conv(x_nchw, p["w5"], p["b5"], 2, 2)      # module attribute named "conv3x3"
    yd = conv(x_nchw, p["wdep"], p["bdep"], 2, 1, groups=x_nchw.shape[1])
    y3 = conv(yd, p["wpt"], p["bpt"], 1, 0)
    r = jnp.maximum(x_nchw, 0.0)
    h = jnp.concatenate([conv(r, p["ws1"], None, 2, 0),
                         conv(r[:, :, 1:, 1:], p["ws2"], None, 2, 0)], axis=1)
    mu = jnp.mean(h, axis=(0, 2, 3), keepdims=True)
    var = jnp.mean((h - mu) ** 2, axis=(0, 2, 3), keepdims=True)
    y4 = ((h - mu) * jax.lax.rsqrt(var + 1e-5) * p["bn_gamma"][None, :, None, None]
          + p["bn_beta"][None, :, None, None])
    return alpha[0] * y0 + alpha[1] * y1 + alpha[2] * y2 + alpha[3] * y3 + alpha[4] * y4


def init_params(key, cin, cout):
    ks = jax.random.split(key, 12)
    s = 0.1
    return {
        "w7":   s * jax.random.normal(ks[0],  (cout, cin, 7, 7), jnp.float32),
        "b7":   s * jax.random.normal(ks[1],  (cout,),           jnp.float32),
        "w3":   s * jax.random.normal(ks[2],  (cout, cin, 3, 3), jnp.float32),
        "b3":   s * jax.random.normal(ks[3],  (cout,),           jnp.float32),
        "w5":   s * jax.random.normal(ks[4],  (cout, cin, 5, 5), jnp.float32),
        "b5":   s * jax.random.normal(ks[5],  (cout,),           jnp.float32),
        "wdep": s * jax.random.normal(ks[6],  (cin, 1, 3, 3),    jnp.float32),
        "bdep": s * jax.random.normal(ks[7],  (cin,),            jnp.float32),
        "wpt":  s * jax.random.normal(ks[8],  (cout, cin, 1, 1), jnp.float32),
        "bpt":  s * jax.random.normal(ks[9],  (cout,),           jnp.float32),
        "ws1":  s * jax.random.normal(ks[10], (cout // 2, cin, 1, 1), jnp.float32),
        "ws2":  s * jax.random.normal(ks[11], (cout // 2, cin, 1, 1), jnp.float32),
        "bn_gamma": jnp.ones((cout,), jnp.float32),   # torch BatchNorm2d affine defaults
        "bn_beta":  jnp.zeros((cout,), jnp.float32),
    }


if __name__ == "__main__":
    key = jax.random.PRNGKey(0)
    kx, kp, ka = jax.random.split(key, 3)
    N, Cin, H, W, Cout = 2, 4, 16, 16, 8
    x = jax.random.normal(kx, (N, Cin, H, W), jnp.float32)          # PyTorch-style NCHW
    params = init_params(kp, Cin, Cout)
    alpha = jax.nn.softmax(jax.random.normal(ka, (5,), jnp.float32))  # forward() argument

    fwd = jax.jit(conv_pool_block_forward,
                  static_argnames=("matmul_dtype", "out_dtype", "row_tile"))

    # main (performance) path: bf16 MXU operands + bf16 lane-dense writeback, f32 accum
    out = fwd(x, alpha, params)
    jax.block_until_ready(out)
    assert out.shape == (N, H // 2, W // 2, Cout)
    assert bool(jnp.all(jnp.isfinite(out.astype(jnp.float32))))

    # parity check against the pure-JAX reference (NCHW -> NHWC for comparison)
    ref = jnp.transpose(_ref_forward(x, alpha, params), (0, 2, 3, 1))
    out_f32 = fwd(x, alpha, params, matmul_dtype=jnp.float32, out_dtype=jnp.float32)
    np.testing.assert_allclose(np.asarray(out_f32), np.asarray(ref), rtol=1e-2, atol=1e-2)
    np.testing.assert_allclose(np.asarray(out.astype(jnp.float32)), np.asarray(ref),
                               rtol=5e-2, atol=5e-2)

    print("KERNEL_OK")
</pallas_src>

<mosaic_0001>
module attributes {stable_mosaic.version = 11 : i64} {
  func.func @_fused_kernel(%arg0: i32, %arg1: memref<64x256xbf16, #tpu.memory_space<vmem>>, %arg2: memref<256x128xbf16, #tpu.memory_space<vmem>>, %arg3: memref<1x128xf32, #tpu.memory_space<vmem>>, %arg4: memref<64x128xbf16, #tpu.memory_space<vmem>>) attributes {dimension_semantics = [#tpu.dimension_semantics<parallel>], iteration_bounds = array<i64: 2>, scalar_prefetch = 0 : i64, scratch_operands = 0 : i64, tpu.core_type = #tpu.core_type<tc>, window_params = [{transform_indices = @transform_0, window_bounds = array<i64: 64, 256>}, {pipeline_mode = #tpu.pipeline_mode<synchronous>, transform_indices = @transform_1, window_bounds = array<i64: 256, 128>}, {pipeline_mode = #tpu.pipeline_mode<synchronous>, transform_indices = @transform_2, window_bounds = array<i64: 1, 128>}, {transform_indices = @transform_3, window_bounds = array<i64: 64, 128>}]} {
    %c0 = arith.constant 0 : index
    %c0_0 = arith.constant 0 : index
    %0 = vector.load %arg1[%c0, %c0_0] : memref<64x256xbf16, #tpu.memory_space<vmem>>, vector<64x256xbf16>
    %c0_1 = arith.constant 0 : index
    %c0_2 = arith.constant 0 : index
    %1 = vector.load %arg2[%c0_1, %c0_2] : memref<256x128xbf16, #tpu.memory_space<vmem>>, vector<256x128xbf16>
    %cst = arith.constant dense<0.000000e+00> : vector<64x128xf32>
    %2 = tpu.matmul %0, %1, %cst {dimension_numbers = #tpu.dot_dimension_numbers<[1], [0], [0], [1], [0, 0, 1, 1], [], []>} : vector<64x256xbf16>, vector<256x128xbf16>, vector<64x128xf32> -> vector<64x128xf32>
    %c0_3 = arith.constant 0 : index
    %c0_4 = arith.constant 0 : index
    %3 = vector.load %arg3[%c0_3, %c0_4] : memref<1x128xf32, #tpu.memory_space<vmem>>, vector<1x128xf32>
    %4 = vector.broadcast %3 : vector<1x128xf32> to vector<64x128xf32>
    %5 = arith.addf %2, %4 : vector<64x128xf32>
    %6 = arith.truncf %5 : vector<64x128xf32> to vector<64x128xbf16>
    %c0_5 = arith.constant 0 : index
    %c0_6 = arith.constant 0 : index
    %7 = vector.load %arg4[%c0_5, %c0_6] : memref<64x128xbf16, #tpu.memory_space<vmem>>, vector<64x128xbf16>
    tpu.vector_store %arg4[%c0_5, %c0_6], %6 {strides = array<i32>} : memref<64x128xbf16, #tpu.memory_space<vmem>>, vector<64x128xbf16>,
    return
  }
  func.func @transform_0(%arg0: i32) -> (i32, i32) {
    %c0_i32 = arith.constant 0 : i32
    %c0_i32_0 = arith.constant 0 : i32
    return %arg0, %c0_i32 : i32, i32
  }
  func.func @transform_1(%arg0: i32) -> (i32, i32) {
    %c0_i32 = arith.constant 0 : i32
    %c0_i32_0 = arith.constant 0 : i32
    %c0_i32_1 = arith.constant 0 : i32
    return %c0_i32, %c0_i32_0 : i32, i32
  }
  func.func @transform_2(%arg0: i32) -> (i32, i32) {
    %c0_i32 = arith.constant 0 : i32
    %c0_i32_0 = arith.constant 0 : i32
    %c0_i32_1 = arith.constant 0 : i32
    return %c0_i32, %c0_i32_0 : i32, i32
  }
  func.func @transform_3(%arg0: i32) -> (i32, i32) {
    %c0_i32 = arith.constant 0 : i32
    %c0_i32_0 = arith.constant 0 : i32
    return %arg0, %c0_i32 : i32, i32
  }
}

</mosaic_0001>

<bundles_post_ra>
// kernel: conv_pool_block_forward.1
= control target key start
LH: loop header
LB: loop body
LE: loop exit
PB: predicated region body
PF: predicated region fallthrough
CT: control target
= control target key end

     0   :  { %8 = vsyncpa [#allocation3], 0  ;;  %s998_s0 = inlined_call_operand.vmem [shape: bf16[128,256], index: 0, kind: input, shape index: {}]   ;;  %s999_s1 = inlined_call_operand.vmem [shape: bf16[256,128], index: 1, kind: input, shape index: {}]   ;;  %s1000_s2 = inlined_call_operand.vmem [shape: f32[1,128], index: 2, kind: input, shape index: {}]   ;;  %s1001_s3 = inlined_call_operand.hbm [shape: bf16[128,128], index: 3, kind: output, shape index: {}]  }
   0x1   :  { %10 = vsyncpa [#allocation3 + $0x1], 0  ;;  %s831_s12 = smov 0   ;;  %s833_s13 = smov 0  }
   0x2   :  { %s835_s14 = smov 0   ;;  %s837_s15 = smov 0  }
   0x3 LB: > { %s852_s16 = sadd.s32 4294967295, %s806_s15   ;;  %s540_s17 = sadd.s32 4294967294, %s806_s15   ;;  %s806_s15 = sphi %s837_s15, %s1007_s15   ;;  %s802_s14 = sphi %s835_s14, %s1006_s14   ;;  %s798_s13 = sphi %s833_s13, %s1005_s13   ;;  %s794_s12 = sphi %s831_s12, %s1004_s12  }
   0x4   : > { %s856_s18 = sadd.s32 1, %s806_s15   ;;  %s91_s19 = sadd.s32 1, %s802_s14 }
   0x5   : > { %s88_s20 = ssub.s32 %s806_s15, %s856_s18  ;;  %p101_p0 = scmp.ne.s32.totalorder %s802_s14, %s798_s13 }
   0x6   : > { %p89_p1 = scmp.eq.s32.totalorder %s88_s20, 0  ;;  %p102_p2 = scmp.eq.s32.totalorder %s852_s16, 1 }
   0x7   : > { %p107_p3 = scmp.ne.s32.totalorder %s798_s13, %s794_s12  ;;  %p108_p4 = scmp.eq.s32.totalorder %s540_s17, 1 }
   0x8   : > { %s867_s21 = scalar_select %p89_p1, %s802_s14, %s91_s19  }
   0x9   : > { %p869_p5 = por %p102_p2, %p101_p0  ;;  %p873_p6 = por %p108_p4, %p107_p3 }
   0xa   : > { %p543_p7 = scmp.ge.s32.totalorder %s806_s15, 1  ;;  %p142_p8 = scmp.lt.s32.totalorder %s806_s15, 3 }
   0xc   : > { %p143_p9 = pnand %p543_p7, %p142_p8 }
   0xd   : > { %v716_v0 = vld [vmem:[%s999_s1 + $0x40] sm:$0xff] (!%p143_p9)   ;;  %s545_s26 = sshll.u32 (!%p143_p9), %s852_s16, 3  ;;  %v718_v2 = vld [vmem:[%s999_s1 + $0x48] sm:$0xff] (!%p143_p9)   ;;  %v720_v4 = vld [vmem:[%s999_s1 + $0x50] sm:$0xff] (!%p143_p9)   ;;  %s164_s25 = sand.u32 (!%p143_p9), 1, %s798_s13  }
   0xe   : > { %146 = sbr.rel (%p143_p9) target bundleno = 290 (0x122), region = 32  ;;  %v717_v1 = vld [vmem:[%s999_s1] sm:$0xff] (!%p143_p9)   ;;  %619 = vmatprep.subr.bf16.mxu0 (!%p143_p9), %v716_v0  ;;  %659 = vmatprep.subr.bf16.mxu1 (!%p143_p9), %v716_v0  ;;  %v719_v3 = vld [vmem:[%s999_s1 + $0x8] sm:$0xff] (!%p143_p9)   ;;  %p168_p10 = scmp.lt.s32.totalorder (!%p143_p9), %s545_s26, 15  ;;  %v721_v5 = vld [vmem:[%s999_s1 + $0x10] sm:$0xff] (!%p143_p9)  }
   0xf   : > { %620 = vmatpush3.bf16.msra.mxu0 (!%p143_p9), %v717_v1  ;;  %667 = vmatpush3.bf16.msra.mxu1 (!%p143_p9), %v717_v1  ;;  %v722_v6 = vld [vmem:[%s999_s1 + $0x58] sm:$0xff] (!%p143_p9)   ;;  %v724_v8 = vld [vmem:[%s999_s1 + $0x60] sm:$0xff] (!%p143_p9)   ;;  %v726_v10 = vld [vmem:[%s999_s1 + $0x68] sm:$0xff] (!%p143_p9)   ;;  %s544_s30 = sshll.u32 (!%p143_p9), %s164_s25, 5  ;;  %s808_s9 = smov (!%p143_p9), [#allocation2]  }
  0x10   : > { %621 = vmatprep.subr.bf16.mxu0 (!%p143_p9), %v718_v2  ;;  %660 = vmatprep.subr.bf16.mxu1 (!%p143_p9), %v718_v2  ;;  %v723_v7 = vld [vmem:[%s999_s1 + $0x18] sm:$0xff] (!%p143_p9)   ;;  %v725_v9 = vld [vmem:[%s999_s1 + $0x20] sm:$0xff] (!%p143_p9)   ;;  %v727_v13 = vld [vmem:[%s999_s1 + $0x28] sm:$0xff] (!%p143_p9)   ;;  %s748_s10 = sshll.u32 (!%p143_p9), %s808_s9, 4  ;;  %s749_s10 = int_to_ptr.vmem [resolvable:$false] %s748_s10 }
  0x11   : > { %v728_v14 = vld [vmem:[%s999_s1 + $0x70] sm:$0xff] (!%p143_p9)   ;;  %v730_v16 = vld [vmem:[%s999_s1 + $0x78] sm:$0xff] (!%p143_p9)   ;;  %v548_v32 = vld [vmem:[%s1000_s2] ss:$0 sm:$0xff] (!%p143_p9)  ;;  %s750_s11 = scalar_lea.vmem (!%p143_p9), %s749_s10, 1024 }
  0x12   : > { %v729_v15 = vld [vmem:[%s999_s1 + $0x30] sm:$0xff] (!%p143_p9)   ;;  %v731_v17 = vld [vmem:[%s999_s1 + $0x38] sm:$0xff] (!%p143_p9)  }
  0x13   : > { %622 = vmatpush3.bf16.msra.mxu0 (!%p143_p9), %v719_v3  ;;  %668 = vmatpush3.bf16.msra.mxu1 (!%p143_p9), %v719_v3 }
  0x14   : > { %623 = vmatprep.subr.bf16.mxu0 (!%p143_p9), %v720_v4  ;;  %661 = vmatprep.subr.bf16.mxu1 (!%p143_p9), %v720_v4 }
  0x15   : > { %s1009_s26 = smov (!%p168_p10, %s545_s26), 15 }
  0x16   : > { %s586_s20 = sshll.u32 %s1009_s26, 3  ;;  %s595_s26 = sshll.u32 %s852_s16, 9 }
  0x17   : > { %624 = vmatpush3.bf16.msra.mxu0 %v721_v5  ;;  %669 = vmatpush3.bf16.msra.mxu1 %v721_v5  ;;  %s910_s29 = scalar_lea.vmem %s998_s0, %s586_s20  ;;  %s953_s7 = scalar_lea.hbm %s1001_s3, %s595_s26 }
  0x18   : > { %625 = vmatprep.subr.bf16.mxu0 %v722_v6  ;;  %662 = vmatprep.subr.bf16.mxu1 %v722_v6  ;;  %v734_v11 = vld [vmem:[%s910_s29 + $0x4] ss:$8 sps:$4 sm:$0xff]   ;;  %v732_v18 = vld [vmem:[%s910_s29] ss:$8 sps:$4 sm:$0xff]   ;;  %v738_v20 = vld [vmem:[%s910_s29 + $0x14] ss:$8 sps:$4 sm:$0xff]  }
  0x19   : > { %v737_v12 = vld [vmem:[%s910_s29 + $0x24] ss:$8 sps:$4 sm:$0xff]   ;;  %391 = vmatprep.mubr.bf16.mxu0 %v734_v11  ;;  %v735_v19 = vld [vmem:[%s910_s29 + $0x20] ss:$8 sps:$4 sm:$0xff]   ;;  %v740_v21 = vld [vmem:[%s910_s29 + $0x34] ss:$8 sps:$4 sm:$0xff]  }
  0x1a   : > { %407 = vmatprep.mubr.bf16.mxu1 %v737_v12  ;;  %v742_v22 = vld [vmem:[%s910_s29 + $0x10] ss:$8 sps:$4 sm:$0xff]   ;;  %s957_s16 = scalar_lea.sflag [#allocation3], %s164_s25 }
  0x1b   : > { %626 = vmatpush3.bf16.msra.mxu0 %v723_v7  ;;  %670 = vmatpush3.bf16.msra.mxu1 %v723_v7  ;;  %v743_v23 = vld [vmem:[%s910_s29 + $0x30] ss:$8 sps:$4 sm:$0xff]   ;;  %s166_s29 = scalar_lea.vmem [#allocation2], %s544_s30 }
  0x1c   : > { %627 = vmatprep.subr.bf16.mxu0 %v724_v8  ;;  %663 = vmatprep.subr.bf16.mxu1 %v724_v8  ;;  %s478_s4 = sshll.u32 %s166_s29, 4  ;;  %s948_s4 = int_to_ptr.vmem [resolvable:$true] %s478_s4 }
  0x1d   : > { %s744_s8 = scalar_lea.vmem %s948_s4, 512  ;;  %p751_p0 = scmp.lt.s32.totalorder %s948_s4, %s749_s10 }
  0x1e   : > { %p745_p11 = scmp.ne.s32.totalorder %s948_s4, %s744_s8  ;;  %p752_p1 = scmp.lt.s32.totalorder %s750_s11, %s744_s8 }
  0x1f   : > { %628 = vmatpush3.bf16.msra.mxu0 %v725_v9  ;;  %671 = vmatpush3.bf16.msra.mxu1 %v725_v9 }
  0x20   : > { %629 = vmatprep.subr.bf16.mxu0 %v726_v10  ;;  %664 = vmatprep.subr.bf16.mxu1 %v726_v10  ;;  %p746_p12 = pnand %p745_p11, %p869_p5  ;;  %p753_p2 = por %p752_p1, %p751_p0 }
  0x22   : > { %p747_p13 = pneg %p746_p12 }
  0x23   : > { %630 = vmatpush3.bf16.msra.mxu0 %v727_v13  ;;  %672 = vmatpush3.bf16.msra.mxu1 %v727_v13 }
  0x24   : > { %631 = vmatprep.subr.bf16.mxu0 %v728_v14  ;;  %665 = vmatprep.subr.bf16.mxu1 %v728_v14  ;;  %p754_p3 = pnand %p753_p2, %p747_p13 }
  0x27   : > { %632 = vmatpush3.bf16.msra.mxu0 %v729_v15  ;;  %673 = vmatpush3.bf16.msra.mxu1 %v729_v15 }
  0x28   : > { %633 = vmatprep.subr.bf16.mxu0 %v730_v16  ;;  %666 = vmatprep.subr.bf16.mxu1 %v730_v16 }
  0x2b   : > { %634 = vmatpush3.bf16.msra.mxu0 %v731_v17  ;;  %674 = vmatpush3.bf16.msra.mxu1 %v731_v17 }
  0x2e   : > { %392 = vmatmul.mubr.bf16.vlgmr.msra.gmra.mrb[0].mxu0 %v732_v18  ;;  %408 = vmatmul.mubr.bf16.vlgmr.msra.gmra.mrb[0].mxu1 %v735_v19 }
  0x2f   : > { %399 = vmatprep.mubr.bf16.mxu0 %v738_v20  ;;  %415 = vmatprep.mubr.bf16.mxu1 %v740_v21 }
  0x36   : > { %400 = vmatmul.mubr.bf16.gmra.mrb[4].mxu0 %v742_v22  ;;  %416 = vmatmul.mubr.bf16.gmra.mrb[4].mxu1 %v743_v23 }
 0x101   : > { %v635_v24 = vpop.f32.mrb[0].mxu0  ;;  %v647_v25 = vpop.f32.mrb[0].mxu1 }
 0x102   : > { %v636_v26 = vpop.f32.mrb[1].mxu0  ;;  %v648_v27 = vpop.f32.mrb[1].mxu1 }
 0x103   : > { %v637_v28 = vadd.f32 %v636_v26, %v635_v24  ;;  %v649_v29 = vadd.f32 %v648_v27, %v647_v25  ;;  %v638_v30 = vpop.f32.mrb[2].mxu0  ;;  %v650_v31 = vpop.f32.mrb[2].mxu1 }
 0x104   : > { %v639_v33 = vpop.f32.mrb[3].mxu0  ;;  %v651_v34 = vpop.f32.mrb[3].mxu1 }
 0x105   : > { %v640_v35 = vadd.f32 %v639_v33, %v638_v30  ;;  %v652_v36 = vadd.f32 %v651_v34, %v650_v31  ;;  %v394_v37 = vadd.f32 %v637_v28, %v548_v32  ;;  %v410_v38 = vadd.f32 %v649_v29, %v548_v32 }
 0x107   : > { %v397_v39 = vadd.f32 %v640_v35, %v548_v32  ;;  %v413_v40 = vadd.f32 %v652_v36, %v548_v32 }
 0x109   : > { %v599_v41 = vpack.c.bf16 %v397_v39, %v394_v37  ;;  %v609_v42 = vpack.c.bf16 %v413_v40, %v410_v38  ;;  %v641_v43 = vpop.f32.mrb[4].mxu0  ;;  %v653_v44 = vpop.f32.mrb[4].mxu1 }
 0x10a   : > { %v642_v45 = vpop.f32.mrb[5].mxu0  ;;  %v654_v46 = vpop.f32.mrb[5].mxu1 }
 0x10b   : > { %600 = vst [vmem:[%s166_s29] sm:$0xff] %v599_v41   ;;  %617 = vst [vmem:[%s166_s29 + $0x10] sm:$0xff] %v609_v42   ;;  %v643_v47 = vadd.f32 %v642_v45, %v641_v43  ;;  %v655_v48 = vadd.f32 %v654_v46, %v653_v44  ;;  %v644_v49 = vpop.f32.mrb[6].mxu0  ;;  %v656_v50 = vpop.f32.mrb[6].mxu1 }
 0x10c   : > { %v645_v51 = vpop.f32.mrb[7].mxu0  ;;  %v657_v52 = vpop.f32.mrb[7].mxu1 }
 0x10d   : > { %v646_v53 = vadd.f32 %v645_v51, %v644_v49  ;;  %v658_v54 = vadd.f32 %v657_v52, %v656_v50  ;;  %v402_v55 = vadd.f32 %v643_v47, %v548_v32  ;;  %v418_v56 = vadd.f32 %v655_v48, %v548_v32 }
 0x10f   : > { %v405_v57 = vadd.f32 %v646_v53, %v548_v32  ;;  %v421_v58 = vadd.f32 %v658_v54, %v548_v32 }
 0x111   : > { %v604_v59 = vpack.c.bf16 %v405_v57, %v402_v55  ;;  %v614_v60 = vpack.c.bf16 %v421_v58, %v418_v56 }
 0x113   : > { %616 = vst [vmem:[%s166_s29 + $0x8] sm:$0xff] %v604_v59   ;;  %618 = vst [vmem:[%s166_s29 + $0x18] sm:$0xff] %v614_v60  }
 0x114   : > { %757 = shalt.err (!%p754_p3)
}
 0x115   : > { %s758_s17 = scalar_lea.hbm %s953_s7, 512  ;;  %s762_s24 = scalar_lea.hbm %s1001_s3, 1024 }
 0x116   : > { %p759_p4 = scmp.ne.s32.totalorder %s953_s7, %s758_s17  ;;  %p763_p9 = scmp.lt.u32.totalorder %s953_s7, %s1001_s3 }
 0x117   : > { %p764_p10 = scmp.lt.u32.totalorder %s762_s24, %s758_s17  ;;  %p766_p12 = scmp.lt.u32.totalorder %s758_s17, %s953_s7 }
 0x118   : > { %p760_p7 = pnand %p759_p4, %p869_p5 }
 0x119   : > { %p765_p11 = por %p764_p10, %p763_p9 }
 0x11a   : > { %p761_p8 = pneg %p760_p7 }
 0x11b   : > { %p767_p13 = por %p766_p12, %p765_p11 }
 0x11d   : > { %p768_p0 = pnand %p767_p13, %p761_p8 }
 0x11f   : > { %771 = shalt.err (!%p768_p0)
}
 0x120   : > { %s809_s28 = smov 64   ;;  %s810_s30 = smov 4  }
 0x121   : > { %675 = dma.vmem_to_hbm [thread:$0]  (%p869_p5), %s948_s4, 512, %s953_s7, %s957_s16, %s809_s28, %s809_s28, %s810_s30  }
 0x122 PF: > { %p681_p1 = scmp.ge.s32.totalorder %s806_s15, 2  ;;  %s493_s29 = sand.u32 1, %s794_s12  }
 0x123   : > { %s494_s26 = scalar_lea.sflag [#allocation3], %s493_s29 }
 0x124   : > { %p678_p2 = pnand %p681_p1, %p873_p6 }
 0x126   : > { %789 = dma.done.wait (!%p678_p2), %s494_s26, 512  }
 0x127   : > { %791 = vsyncadd (!%p678_p2), %s494_s26, 4294966784  ;;  %p13_p3 = scmp.ge.s32.totalorder %s856_s18, 4   ;;  %s1004_s12 = smov %s798_s13 }
 0x128   : > { %s1005_s13 = smov %s802_s14  ;;  %s1006_s14 = smov %s867_s21 }
 0x129   : > { %s1007_s15 = smov %s856_s18  ;;  %15 = sbr.rel (!%p13_p3) target bundleno = 3 (0x3), region = 67 }
 0x130   :  { %499 = vsyncpa [#allocation3], 1 }
 0x131   :  { %501 = vsyncpa [#allocation3 + $0x1], 1 }

</bundles_post_ra>
